<compile_context>
chip_gen: v7x
topology: tpu7x:2x2x1
jax: 0.10.0
libtpu: 0.0.40
codegen_flags: <defaults>
</compile_context>

<pallas_src>
import functools

import jax
import jax.numpy as jnp
from jax.experimental import pallas as pl
from jax.experimental.pallas import tpu as pltpu


def _round_up(x, m):
    return ((x + m - 1) // m) * m


def _vmem_limit_bytes():
    # Generation-aware VMEM budget: ~half of physical VMEM, clamped to
    # [32, 96] MiB (safe on v7x's 64 MiB, uses more of v5e/v6e's 128 MiB).
    cap = 0
    try:
        fn = getattr(pltpu, "get_tpu_info", None)
        if fn is not None:
            cap = int(getattr(fn(), "vmem_capacity_bytes", 0) or 0)
    except Exception:
        cap = 0
    if cap <= 0:
        cap = 64 * 1024 * 1024
    return max(32 * 1024 * 1024, min(cap // 2, 96 * 1024 * 1024))


# ---------------------------------------------------------------------------
# Pallas kernels: bf16 x bf16 -> f32-accumulated matmul with fused ReLU.
# ---------------------------------------------------------------------------
def _matmul_noacc_kernel(a_ref, b_ref, o_ref, *, relu):
    # Single K step: no accumulator scratch, no extra VMEM round-trip.
    acc = jnp.dot(a_ref[...], b_ref[...], preferred_element_type=jnp.float32)
    if relu:
        acc = jnp.maximum(acc, 0.0)
    o_ref[...] = acc.astype(o_ref.dtype)


def _matmul_acc_kernel(a_ref, b_ref, o_ref, acc_ref, *, relu):
    # K (reduction) is the last / innermost grid axis.
    @pl.when(pl.program_id(2) == 0)
    def _init():
        acc_ref[...] = jnp.zeros_like(acc_ref)

    acc_ref[...] += jnp.dot(a_ref[...], b_ref[...],
                            preferred_element_type=jnp.float32)

    @pl.when(pl.program_id(2) == pl.num_programs(2) - 1)
    def _finalize():
        acc = acc_ref[...]
        if relu:
            acc = jnp.maximum(acc, 0.0)
        o_ref[...] = acc.astype(o_ref.dtype)


def pack_weight(b, *, tk_max=512):
    """Pack a (K, N) f32 weight into bf16 (Kp, Np), once, at build time.

    K is padded to a 16-multiple (bf16 sublane alignment) -- or to a
    256-multiple when it will be K-tiled -- and N to a 128-lane multiple so
    output stores are lane-dense.
    """
    K, N = b.shape
    Kp = _round_up(K, 16)
    if Kp > tk_max:
        Kp = _round_up(K, 256)
    Np = _round_up(N, 128)
    if Kp != K or Np != N:
        b = jnp.pad(b, ((0, Kp - K), (0, Np - N)))
    return b.astype(jnp.bfloat16)


def matmul_packed(a, b_packed, *, n_out, relu, out_dtype,
                  tm_max=512, tn_max=512, tk_max=512):
    """a: (M, K) float, b_packed: (Kp, Np) bf16 (from pack_weight).

    Returns (M, n_out) in out_dtype, optionally ReLU'd.
    """
    M, K = a.shape
    Kp, Np = b_packed.shape
    assert Kp >= K and Kp % 16 == 0 and Np % 128 == 0

    # M (sublane axis of A / out): 16-multiples keep bf16 tiles unmasked.
    if M <= tm_max:
        Mp = _round_up(M, 16)
        tm = Mp
    else:
        tm = tm_max
        Mp = _round_up(M, tm)

    # N (lane axis): pre-padded to 128; pick the widest tile dividing Np.
    if Np <= tn_max:
        tn = Np
    elif Np % tn_max == 0:
        tn = tn_max
    elif Np % 256 == 0:
        tn = 256
    else:
        tn = 128

    # K: single shot (scratch-free kernel) when it fits, else stream 256-wide.
    tk = Kp if Kp <= tk_max else 256

    # v7x megacore: guarantee >=2 parallel grid points when possible so
    # "parallel" axes can actually be sharded across the 2 TensorCores.
    if Mp // tm == 1 and Np // tn == 1 and Mp % 32 == 0:
        tm = Mp // 2

    a_p = a.astype(jnp.bfloat16)
    if Mp != M or Kp != K:
        a_p = jnp.pad(a_p, ((0, Mp - M), (0, Kp - K)))

    gm, gn, gk = Mp // tm, Np // tn, Kp // tk

    cost = pl.CostEstimate(
        flops=2 * Mp * Np * Kp,
        transcendentals=0,
        # Account for grid re-reads: A is read gn times, B gm times.
        bytes_accessed=2 * (Mp * Kp * gn + Kp * Np * gm)
        + jnp.dtype(out_dtype).itemsize * Mp * Np,
    )
    vmem_limit = _vmem_limit_bytes()

    if gk == 1:
        out = pl.pallas_call(
            functools.partial(_matmul_noacc_kernel, relu=relu),
            out_shape=jax.ShapeDtypeStruct((Mp, Np), out_dtype),
            grid_spec=pltpu.PrefetchScalarGridSpec(
                num_scalar_prefetch=0,
                grid=(gm, gn),
                in_specs=[
                    pl.BlockSpec((tm, Kp), lambda i, j: (i, 0)),
                    pl.BlockSpec((Kp, tn), lambda i, j: (0, j)),
                ],
                out_specs=pl.BlockSpec((tm, tn), lambda i, j: (i, j)),
            ),
            compiler_params=pltpu.CompilerParams(
                dimension_semantics=("parallel", "parallel"),
                vmem_limit_bytes=vmem_limit,
            ),
            cost_estimate=cost,
        )(a_p, b_packed)
    else:
        out = pl.pallas_call(
            functools.partial(_matmul_acc_kernel, relu=relu),
            out_shape=jax.ShapeDtypeStruct((Mp, Np), out_dtype),
            grid_spec=pltpu.PrefetchScalarGridSpec(
                num_scalar_prefetch=0,
                grid=(gm, gn, gk),
                in_specs=[
                    pl.BlockSpec((tm, tk), lambda i, j, k: (i, k)),
                    pl.BlockSpec((tk, tn), lambda i, j, k: (k, j)),
                ],
                out_specs=pl.BlockSpec((tm, tn), lambda i, j, k: (i, j)),
                scratch_shapes=[pltpu.VMEM((tm, tn), jnp.float32)],
            ),
            compiler_params=pltpu.CompilerParams(
                dimension_semantics=("parallel", "parallel", "arbitrary"),
                vmem_limit_bytes=vmem_limit,
            ),
            cost_estimate=cost,
        )(a_p, b_packed)

    if Mp != M or Np != n_out:
        out = out[:M, :n_out]
    return out


# ---------------------------------------------------------------------------
# Conv2d (no bias) as im2col (jit-fused glue) + Pallas matmul (hot path).
# ---------------------------------------------------------------------------
def conv2d_pallas(x_nhwc, layer):
    # TODO(synk): im2col still materializes KH*KW x the activation bytes in
    # HBM before the kernel; a fully fused conv would fold (kh, kw) into the
    # matmul's K grid axis via shifted BlockSpec windows on the padded input.
    N, H, W, Cin = x_nhwc.shape
    KH = KW = layer['fsize']
    stride = layer['stride']
    padding = layer['padding']
    Ho = (H + 2 * padding - KH) // stride + 1
    Wo = (W + 2 * padding - KW) // stride + 1
    xp = jnp.pad(x_nhwc, ((0, 0), (padding, padding), (padding, padding), (0, 0)))
    # im2col: feature order is (kh, kw, cin) to match w_hwio.reshape packing.
    cols = []
    for kh in range(KH):
        for kw in range(KW):
            cols.append(xp[:, kh:kh + stride * Ho:stride,
                           kw:kw + stride * Wo:stride, :])
    patches = jnp.concatenate(cols, axis=-1).reshape(N * Ho * Wo, KH * KW * Cin)
    y = matmul_packed(patches, layer['b_packed'], n_out=layer['cout'],
                      relu=(layer['act'] == 'relu'),
                      out_dtype=layer['out_dtype'])
    return y.reshape(N, Ho, Wo, layer['cout'])


# ---------------------------------------------------------------------------
# CNET re-implementation (mirrors baseline/baseNetwork.py buildModel/forward).
# ---------------------------------------------------------------------------
class CNETPallas:
    def __init__(self, netData, iSize=3, WH=80, key=None):
        self.netData = netData
        self.iSize = iSize
        self.WH = WH
        self.nLayer = netData['nLayer']
        self.fSize = netData['fSize']
        self.nUnit = netData['nUnit']
        self.padding = netData['padding']
        self.stride = netData['stride']
        act = netData['act']
        if not isinstance(act, list):
            act = [act for _ in range(self.nLayer)]
        self.act = list(act)
        self.linear = netData.get('linear', 'False') == 'True'
        if self.linear:
            self.act[-1] = 'linear'
        self.BN = netData.get('BN', 'False') == 'True'
        # TODO(synk): BatchNorm branch not exercised (netData['BN'] is False here).
        self._build(key if key is not None else jax.random.PRNGKey(0))
        self._forward_jit = jax.jit(self._forward)

    def _build(self, key):
        self.layers = []
        c = self.iSize
        h = w = self.WH
        feat = None
        mode = True
        flatten_dims = None
        keys = jax.random.split(key, max(self.nLayer, 1))
        for i, fSize in enumerate(self.fSize):
            if fSize == -1:
                mode = False
            if mode:
                cout = self.nUnit[i]
                w_hwio = 0.1 * jax.random.normal(
                    keys[i], (fSize, fSize, c, cout), jnp.float32)
                b = w_hwio.reshape(fSize * fSize * c, cout)
                self.layers.append(dict(kind='conv', w=w_hwio,
                                        b_packed=pack_weight(b),
                                        fsize=fSize, cout=cout,
                                        stride=self.stride[i],
                                        padding=self.padding[i],
                                        act=self.act[i]))
                h = (h + 2 * self.padding[i] - fSize) // self.stride[i] + 1
                w = (w + 2 * self.padding[i] - fSize) // self.stride[i] + 1
                c = cout
            elif fSize == -1:
                self.layers.append(dict(kind='flatten'))
                feat = c * h * w
                flatten_dims = (c, h, w)
            else:
                # Canonical weight: rows in NCHW-flatten order (PyTorch semantics).
                w_lin = 0.1 * jax.random.normal(keys[i], (feat, fSize), jnp.float32)
                if flatten_dims is not None:
                    # Fold the NCHW<->NHWC relayout of nn.Flatten into the first
                    # linear weight (init-time permutation; no runtime transpose).
                    cc, hh, ww = flatten_dims
                    w_kernel = (w_lin.reshape(cc, hh, ww, fSize)
                                .transpose(1, 2, 0, 3)
                                .reshape(feat, fSize))
                    flatten_dims = None
                else:
                    w_kernel = w_lin
                self.layers.append(dict(kind='mlp', w=w_lin,
                                        b_packed=pack_weight(w_kernel),
                                        cout=fSize, act=self.act[i]))
                feat = fSize
        # Inter-layer activations are bf16; the final compute layer writes f32.
        compute_idx = [j for j, L in enumerate(self.layers) if L['kind'] != 'flatten']
        for j in compute_idx:
            self.layers[j]['out_dtype'] = jnp.bfloat16
        if compute_idx:
            self.layers[compute_idx[-1]]['out_dtype'] = jnp.float32

    def _forward(self, x_nchw):
        # NCHW -> NHWC once, at the input; bf16 activations through the stack.
        x = jnp.transpose(x_nchw, (0, 2, 3, 1)).astype(jnp.bfloat16)
        for layer in self.layers:
            if layer['kind'] == 'conv':
                x = conv2d_pallas(x, layer)
            elif layer['kind'] == 'flatten':
                # NHWC flatten; NCHW ordering is folded into the first MLP weight.
                x = x.reshape(x.shape[0], -1)
            else:  # mlp
                x = matmul_packed(x, layer['b_packed'], n_out=layer['cout'],
                                  relu=(layer['act'] == 'relu'),
                                  out_dtype=layer['out_dtype'])
        return x

    def __call__(self, x_nchw):
        return self._forward_jit(x_nchw)

    # Pure-JAX f32 reference (XLA convs, NCHW, PyTorch-ordered flatten).
    def reference(self, x_nchw):
        x = x_nchw
        for layer in self.layers:
            if layer['kind'] == 'conv':
                w_oihw = jnp.transpose(layer['w'], (3, 2, 0, 1))
                p = layer['padding']
                x = jax.lax.conv_general_dilated(
                    x, w_oihw, window_strides=(layer['stride'], layer['stride']),
                    padding=[(p, p), (p, p)],
                    dimension_numbers=('NCHW', 'OIHW', 'NCHW'))
                if layer['act'] == 'relu':
                    x = jnp.maximum(x, 0.0)
            elif layer['kind'] == 'flatten':
                x = x.reshape(x.shape[0], -1)
            else:
                x = x @ layer['w']
                if layer['act'] == 'relu':
                    x = jnp.maximum(x, 0.0)
        return x


if __name__ == "__main__":
    # Small synthetic config: two convs -> flatten -> linear head (no bias).
    netData = {
        'nLayer': 4,
        'fSize': [3, 3, -1, 32],
        'nUnit': [8, 16, 0, 0],
        'padding': [1, 1, 0, 0],
        'stride': [2, 2, 1, 1],
        'act': 'relu',
        'linear': 'True',
    }
    key = jax.random.PRNGKey(0)
    k_params, k_x = jax.random.split(key)
    net = CNETPallas(netData, iSize=4, WH=16, key=k_params)

    x = jax.random.normal(k_x, (2, 4, 16, 16), jnp.float32)  # NCHW, like PyTorch

    y = net(x)
    jax.block_until_ready(y)

    y_ref = net.reference(x)
    assert y.shape == (2, 32), y.shape
    # Tolerance loosened vs. the f32 reference because the kernel path uses
    # bf16 MXU operands (f32 accumulation).
    assert jnp.allclose(y, y_ref, rtol=5e-2, atol=5e-2), \
        float(jnp.max(jnp.abs(y - y_ref)))

    print("KERNEL_OK")
</pallas_src>

<mosaic_0001>
module attributes {stable_mosaic.version = 11 : i64} {
  func.func @_matmul_noacc_kernel(%arg0: i32, %arg1: i32, %arg2: memref<64x48xbf16, #tpu.memory_space<vmem>>, %arg3: memref<48x128xbf16, #tpu.memory_space<vmem>>, %arg4: memref<64x128xbf16, #tpu.memory_space<vmem>>) attributes {dimension_semantics = [#tpu.dimension_semantics<parallel>, #tpu.dimension_semantics<parallel>], iteration_bounds = array<i64: 2, 1>, scalar_prefetch = 0 : i64, scratch_operands = 0 : i64, tpu.core_type = #tpu.core_type<tc>, window_params = [{transform_indices = @transform_0, window_bounds = array<i64: 64, 48>}, {transform_indices = @transform_1, window_bounds = array<i64: 48, 128>}, {transform_indices = @transform_2, window_bounds = array<i64: 64, 128>}]} {
    %c0 = arith.constant 0 : index
    %c0_0 = arith.constant 0 : index
    %0 = vector.load %arg2[%c0, %c0_0] : memref<64x48xbf16, #tpu.memory_space<vmem>>, vector<64x48xbf16>
    %c0_1 = arith.constant 0 : index
    %c0_2 = arith.constant 0 : index
    %1 = vector.load %arg3[%c0_1, %c0_2] : memref<48x128xbf16, #tpu.memory_space<vmem>>, vector<48x128xbf16>
    %cst = arith.constant dense<0.000000e+00> : vector<64x128xf32>
    %2 = tpu.matmul %0, %1, %cst {dimension_numbers = #tpu.dot_dimension_numbers<[1], [0], [0], [1], [0, 0, 1, 1], [], []>} : vector<64x48xbf16>, vector<48x128xbf16>, vector<64x128xf32> -> vector<64x128xf32>
    %cst_3 = arith.constant 0.000000e+00 : f32
    %3 = vector.broadcast %cst_3 : f32 to vector<64x128xf32>
    %4 = arith.maximumf %2, %3 : vector<64x128xf32>
    %5 = arith.truncf %4 : vector<64x128xf32> to vector<64x128xbf16>
    %c0_4 = arith.constant 0 : index
    %c0_5 = arith.constant 0 : index
    %6 = vector.load %arg4[%c0_4, %c0_5] : memref<64x128xbf16, #tpu.memory_space<vmem>>, vector<64x128xbf16>
    tpu.vector_store %arg4[%c0_4, %c0_5], %5 {strides = array<i32>} : memref<64x128xbf16, #tpu.memory_space<vmem>>, vector<64x128xbf16>,
    return
  }
  func.func @transform_0(%arg0: i32, %arg1: i32) -> (i32, i32) {
    %c0_i32 = arith.constant 0 : i32
    %c0_i32_0 = arith.constant 0 : i32
    return %arg0, %c0_i32 : i32, i32
  }
  func.func @transform_1(%arg0: i32, %arg1: i32) -> (i32, i32) {
    %c0_i32 = arith.constant 0 : i32
    %c0_i32_0 = arith.constant 0 : i32
    return %c0_i32, %arg1 : i32, i32
  }
  func.func @transform_2(%arg0: i32, %arg1: i32) -> (i32, i32) {
    %c0_i32 = arith.constant 0 : i32
    return %arg0, %arg1 : i32, i32
  }
}

module attributes {stable_mosaic.version = 11 : i64} {
  func.func @_matmul_noacc_kernel(%arg0: i32, %arg1: i32, %arg2: memref<16x80xbf16, #tpu.memory_space<vmem>>, %arg3: memref<80x128xbf16, #tpu.memory_space<vmem>>, %arg4: memref<16x128xbf16, #tpu.memory_space<vmem>>) attributes {dimension_semantics = [#tpu.dimension_semantics<parallel>, #tpu.dimension_semantics<parallel>], iteration_bounds = array<i64: 2, 1>, scalar_prefetch = 0 : i64, scratch_operands = 0 : i64, tpu.core_type = #tpu.core_type<tc>, window_params = [{transform_indices = @transform_0, window_bounds = array<i64: 16, 80>}, {transform_indices = @transform_1, window_bounds = array<i64: 80, 128>}, {transform_indices = @transform_2, window_bounds = array<i64: 16, 128>}]} {
    %c0 = arith.constant 0 : index
    %c0_0 = arith.constant 0 : index
    %0 = vector.load %arg2[%c0, %c0_0] : memref<16x80xbf16, #tpu.memory_space<vmem>>, vector<16x80xbf16>
    %c0_1 = arith.constant 0 : index
    %c0_2 = arith.constant 0 : index
    %1 = vector.load %arg3[%c0_1, %c0_2] : memref<80x128xbf16, #tpu.memory_space<vmem>>, vector<80x128xbf16>
    %cst = arith.constant dense<0.000000e+00> : vector<16x128xf32>
    %2 = tpu.matmul %0, %1, %cst {dimension_numbers = #tpu.dot_dimension_numbers<[1], [0], [0], [1], [0, 0, 1, 1], [], []>} : vector<16x80xbf16>, vector<80x128xbf16>, vector<16x128xf32> -> vector<16x128xf32>
    %cst_3 = arith.constant 0.000000e+00 : f32
    %3 = vector.broadcast %cst_3 : f32 to vector<16x128xf32>
    %4 = arith.maximumf %2, %3 : vector<16x128xf32>
    %5 = arith.truncf %4 : vector<16x128xf32> to vector<16x128xbf16>
    %c0_4 = arith.constant 0 : index
    %c0_5 = arith.constant 0 : index
    %6 = vector.load %arg4[%c0_4, %c0_5] : memref<16x128xbf16, #tpu.memory_space<vmem>>, vector<16x128xbf16>
    tpu.vector_store %arg4[%c0_4, %c0_5], %5 {strides = array<i32>} : memref<16x128xbf16, #tpu.memory_space<vmem>>, vector<16x128xbf16>,
    return
  }
  func.func @transform_0(%arg0: i32, %arg1: i32) -> (i32, i32) {
    %c0_i32 = arith.constant 0 : i32
    %c0_i32_0 = arith.constant 0 : i32
    return %arg0, %c0_i32 : i32, i32
  }
  func.func @transform_1(%arg0: i32, %arg1: i32) -> (i32, i32) {
    %c0_i32 = arith.constant 0 : i32
    %c0_i32_0 = arith.constant 0 : i32
    return %c0_i32, %arg1 : i32, i32
  }
  func.func @transform_2(%arg0: i32, %arg1: i32) -> (i32, i32) {
    %c0_i32 = arith.constant 0 : i32
    return %arg0, %arg1 : i32, i32
  }
}

module attributes {stable_mosaic.version = 11 : i64} {
  func.func @_matmul_noacc_kernel(%arg0: i32, %arg1: i32, %arg2: memref<16x256xbf16, #tpu.memory_space<vmem>>, %arg3: memref<256x128xbf16, #tpu.memory_space<vmem>>, %arg4: memref<16x128xf32, #tpu.memory_space<vmem>>) attributes {dimension_semantics = [#tpu.dimension_semantics<parallel>, #tpu.dimension_semantics<parallel>], iteration_bounds = array<i64: 1, 1>, scalar_prefetch = 0 : i64, scratch_operands = 0 : i64, tpu.core_type = #tpu.core_type<tc>, window_params = [{transform_indices = @transform_0, window_bounds = array<i64: 16, 256>}, {transform_indices = @transform_1, window_bounds = array<i64: 256, 128>}, {transform_indices = @transform_2, window_bounds = array<i64: 16, 128>}]} {
    %c0 = arith.constant 0 : index
    %c0_0 = arith.constant 0 : index
    %0 = vector.load %arg2[%c0, %c0_0] : memref<16x256xbf16, #tpu.memory_space<vmem>>, vector<16x256xbf16>
    %c0_1 = arith.constant 0 : index
    %c0_2 = arith.constant 0 : index
    %1 = vector.load %arg3[%c0_1, %c0_2] : memref<256x128xbf16, #tpu.memory_space<vmem>>, vector<256x128xbf16>
    %cst = arith.constant dense<0.000000e+00> : vector<16x128xf32>
    %2 = tpu.matmul %0, %1, %cst {dimension_numbers = #tpu.dot_dimension_numbers<[1], [0], [0], [1], [0, 0, 1, 1], [], []>} : vector<16x256xbf16>, vector<256x128xbf16>, vector<16x128xf32> -> vector<16x128xf32>
    %c0_3 = arith.constant 0 : index
    %c0_4 = arith.constant 0 : index
    %3 = vector.load %arg4[%c0_3, %c0_4] : memref<16x128xf32, #tpu.memory_space<vmem>>, vector<16x128xf32>
    tpu.vector_store %arg4[%c0_3, %c0_4], %2 {strides = array<i32>} : memref<16x128xf32, #tpu.memory_space<vmem>>, vector<16x128xf32>,
    return
  }
  func.func @transform_0(%arg0: i32, %arg1: i32) -> (i32, i32) {
    %c0_i32 = arith.constant 0 : i32
    %c0_i32_0 = arith.constant 0 : i32
    return %arg0, %c0_i32 : i32, i32
  }
  func.func @transform_1(%arg0: i32, %arg1: i32) -> (i32, i32) {
    %c0_i32 = arith.constant 0 : i32
    %c0_i32_0 = arith.constant 0 : i32
    return %c0_i32, %arg1 : i32, i32
  }
  func.func @transform_2(%arg0: i32, %arg1: i32) -> (i32, i32) {
    %c0_i32 = arith.constant 0 : i32
    return %arg0, %arg1 : i32, i32
  }
}

</mosaic_0001>

<bundles_post_ra>
// kernel: _forward.3
= control target key start
LH: loop header
LB: loop body
LE: loop exit
PB: predicated region body
PF: predicated region fallthrough
CT: control target
= control target key end

     0   :  { %s612_s9 = smov 0   ;;  %s614_s10 = smov 0   ;;  %s661_s0 = inlined_call_operand.vmem [shape: bf16[128,48], index: 0, kind: input, shape index: {}]   ;;  %s662_s1 = inlined_call_operand.vmem [shape: bf16[48,128], index: 1, kind: input, shape index: {}]   ;;  %s663_s2 = inlined_call_operand.vmem [shape: bf16[128,128], index: 2, kind: output, shape index: {}]  }
   0x1   :  { %s616_s11 = smov 0  }
   0x2 LB: > { %s24_s12 = sadd.s32 1, %s591_s10  ;;  %p458_p0 = scmp.ge.s32.totalorder %s595_s11, 1  ;;  %s595_s11 = sphi %s616_s11, %s12_s11   ;;  %s591_s10 = sphi %s614_s10, %s665_s10   ;;  %s587_s9 = sphi %s612_s9, %s664_s9  }
   0x3   : > { %p26_p1 = scmp.ge.s32.totalorder %s24_s12, 2  ;;  %p136_p2 = scmp.lt.s32.totalorder %s595_s11, 3 }
   0x5   : > { %s667_s12 = smov (%p26_p1, %s24_s12), 0  ;;  %p137_p3 = pnand %p458_p0, %p136_p2 }
   0x6   : > { %v566_v0 = vld [vmem:[%s662_s1] sm:$0xff] (!%p137_p3)   ;;  %s459_s15 = sshll.u32 (!%p137_p3), %s587_s9, 3  ;;  %v567_v1 = vld [vmem:[%s662_s1 + $0x8] sm:$0xff] (!%p137_p3)   ;;  %v568_v2 = vld [vmem:[%s662_s1 + $0x10] sm:$0xff] (!%p137_p3)   ;;  %vm237_vm0 = vcmask (!%p137_p3), 392192  }
   0x7   : > { %140 = sbr.rel (%p137_p3) target bundleno = 239 (0xef), region = 28  ;;  %p166_p4 = scmp.lt.s32.totalorder (!%p137_p3), %s459_s15, 15  ;;  %522 = vmatprep.subr.bf16.mxu0 (!%p137_p3), %v566_v0  ;;  %536 = vmatprep.subr.bf16.mxu1 (!%p137_p3), %v566_v0 }
   0x8   : > { %523 = vmatpush3.bf16.msra.mxu0 (!%p137_p3), %v566_v0  ;;  %539 = vmatpush3.bf16.msra.mxu1 (!%p137_p3), %v566_v0 }
   0x9   : > { %524 = vmatprep.subr.bf16.mxu0 (!%p137_p3), %v567_v1  ;;  %537 = vmatprep.subr.bf16.mxu1 (!%p137_p3), %v567_v1 }
   0xc   : > { %525 = vmatpush3.bf16.msra.mxu0 (!%p137_p3), %v567_v1  ;;  %540 = vmatpush3.bf16.msra.mxu1 (!%p137_p3), %v567_v1 }
   0xd   : > { %526 = vmatprep.subr.bf16.mxu0 (!%p137_p3), %v568_v2  ;;  %538 = vmatprep.subr.bf16.mxu1 (!%p137_p3), %v568_v2 }
   0xe   : > { %s669_s15 = smov (!%p166_p4, %s459_s15), 15 }
   0xf   : > { %s460_s20 = sshll.u32 %s669_s15, 2 }
  0x10   : > { %s169_s23 = scalar_lea.vmem %s661_s0, %s460_s20  ;;  %527 = vmatpush3.bf16.msra.mxu0 %v568_v2  ;;  %541 = vmatpush3.bf16.msra.mxu1 %v568_v2  ;;  %s182_s26 = scalar_lea.vmem %s663_s2, %s460_s20 }
  0x11   : > { %v569_v3 = vld [vmem:[%s169_s23] sm:$0xff]   ;;  %v570_v4 = vld [vmem:[%s169_s23 + $0x10] sm:$0xff]   ;;  %v571_v5 = vld [vmem:[%s169_s23 + $0x8] sm:$0xff]  }
  0x12   : > { %528 = vmatprep.mubr.msk.bf16.mxu0 %vm237_vm0, %v569_v3  ;;  %532 = vmatprep.mubr.msk.bf16.mxu1 %vm237_vm0, %v570_v4  ;;  %v572_v6 = vld [vmem:[%s169_s23 + $0x18] sm:$0xff]  }
  0x13   : > { %529 = vmatmul.mubr.msk.bf16.vlgmr.msra.gmra.mrb[0].mxu0 %vm237_vm0, %v571_v5  ;;  %533 = vmatmul.mubr.msk.bf16.vlgmr.msra.gmra.mrb[0].mxu1 %vm237_vm0, %v572_v6 }
  0xe6   : > { %v530_v7 = vpop.f32.mrb[0].mxu0  ;;  %v534_v8 = vpop.f32.mrb[0].mxu1 }
  0xe7   : > { %v284_v9 = vpop.f32.mrb[1].mxu0  ;;  %v300_v10 = vpop.f32.mrb[1].mxu1  ;;  %v317_v13 = vmax.f32 %v530_v7, 0.0  ;;  %v321_v14 = vmax.f32 %v534_v8, 0.0 }
  0xe8   : > { %v531_v11 = vpop.f32.mrb[2].mxu0  ;;  %v535_v12 = vpop.f32.mrb[2].mxu1  ;;  %v315_v19 = vmax.f32 %v284_v9, 0.0  ;;  %v319_v20 = vmax.f32 %v300_v10, 0.0 }
  0xe9   : > { %v318_v15 = vmax.f32 %v531_v11, 0.0  ;;  %v322_v16 = vmax.f32 %v535_v12, 0.0  ;;  %v287_v17 = vpop.f32.mrb[3].mxu0  ;;  %v303_v18 = vpop.f32.mrb[3].mxu1 }
  0xea   : > { %v316_v21 = vmax.f32 %v287_v17, 0.0  ;;  %v320_v22 = vmax.f32 %v303_v18, 0.0 }
  0xeb   : > { %v500_v23 = vpack.c.bf16 %v318_v15, %v317_v13  ;;  %v510_v24 = vpack.c.bf16 %v322_v16, %v321_v14 }
  0xec   : > { %v495_v25 = vpack.c.bf16 %v316_v21, %v315_v19  ;;  %v505_v26 = vpack.c.bf16 %v320_v22, %v319_v20 }
  0xed   : > { %512 = vst [vmem:[%s182_s26 + $0x8] sm:$0xff] %v500_v23   ;;  %514 = vst [vmem:[%s182_s26 + $0x18] sm:$0xff] %v510_v24  }
  0xee   : > { %496 = vst [vmem:[%s182_s26] sm:$0xff] %v495_v25   ;;  %513 = vst [vmem:[%s182_s26 + $0x10] sm:$0xff] %v505_v26  }
  0xef PF: > { %s12_s11 = sadd.s32 1, %s595_s11   ;;  %s664_s9 = smov %s591_s10 }
  0xf0   : > { %p9_p5 = scmp.ge.s32.totalorder %s12_s11, 4   ;;  %s665_s10 = smov %s667_s12 }
  0xf2   :  { %11 = sbr.rel (!%p9_p5) target bundleno = 2 (0x2), region = 61 }

// kernel: _forward.4
= control target key start
LH: loop header
LB: loop body
LE: loop exit
PB: predicated region body
PF: predicated region fallthrough
CT: control target
= control target key end

     0   :  { %s500_s9 = smov 0   ;;  %s502_s10 = smov 0   ;;  %s548_s0 = inlined_call_operand.vmem [shape: bf16[32,80], index: 0, kind: input, shape index: {}]   ;;  %s549_s1 = inlined_call_operand.vmem [shape: bf16[80,128], index: 1, kind: input, shape index: {}]   ;;  %s550_s2 = inlined_call_operand.vmem [shape: bf16[32,128], index: 2, kind: output, shape index: {}]  }
   0x1   :  { %s504_s11 = smov 0  }
   0x2 LB: > { %s24_s12 = sadd.s32 1, %s477_s10  ;;  %p384_p0 = scmp.ge.s32.totalorder %s481_s11, 1  ;;  %s481_s11 = sphi %s504_s11, %s12_s11   ;;  %s477_s10 = sphi %s502_s10, %s552_s10   ;;  %s473_s9 = sphi %s500_s9, %s551_s9  }
   0x3   : > { %p26_p1 = scmp.ge.s32.totalorder %s24_s12, 2  ;;  %p136_p2 = scmp.lt.s32.totalorder %s481_s11, 3 }
   0x5   : > { %s554_s12 = smov (%p26_p1, %s24_s12), 0  ;;  %p137_p3 = pnand %p384_p0, %p136_p2 }
   0x6   : > { %v453_v0 = vld [vmem:[%s549_s1] sm:$0xff] (!%p137_p3)   ;;  %v483_v1 = vmov (!%p137_p3), 0.0   ;;  %v454_v2 = vld [vmem:[%s549_s1 + $0x8] sm:$0xff] (!%p137_p3)   ;;  %vm484_vm0 = vmmov (!%p137_p3), 0   ;;  %s385_s17 = sshll.u32 (!%p137_p3), %s473_s9, 1  ;;  %v455_v3 = vld [vmem:[%s549_s1 + $0x10] sm:$0xff] (!%p137_p3)  }
   0x7   : > { %140 = sbr.rel (%p137_p3) target bundleno = 246 (0xf6), region = 28  ;;  %413 = vmatprep.subr.bf16.mxu0 (!%p137_p3), %v483_v1  ;;  %423 = vmatprep.mubr.msk.bf16.mxu0 (!%p137_p3), %vm484_vm0, %v483_v1  ;;  %p166_p4 = scmp.lt.s32.totalorder (!%p137_p3), %s385_s17, 3  ;;  %v456_v4 = vld [vmem:[%s549_s1 + $0x18] sm:$0xff] (!%p137_p3)   ;;  %v457_v5 = vld [vmem:[%s549_s1 + $0x20] sm:$0xff] (!%p137_p3)   ;;  %vm232_vm1 = vcmask (!%p137_p3), 654336  }
   0x8   : > { %414 = vmatpush3.bf16.msra.mxu0 (!%p137_p3), %v453_v0 }
   0x9   : > { %415 = vmatprep.subr.bf16.mxu0 (!%p137_p3), %v483_v1 }
   0xc   : > { %416 = vmatpush3.bf16.msra.mxu0 (!%p137_p3), %v454_v2 }
   0xd   : > { %417 = vmatprep.subr.bf16.mxu0 (!%p137_p3), %v483_v1 }
   0xe   : > { %s556_s17 = smov (!%p166_p4, %s385_s17), 3 }
   0xf   : > { %s386_s20 = sshll.u32 %s556_s17, 2 }
  0x10   : > { %s169_s23 = scalar_lea.vmem %s548_s0, %s386_s20  ;;  %418 = vmatpush3.bf16.msra.mxu0 %v455_v3  ;;  %s182_s30 = scalar_lea.vmem %s550_s2, %s386_s20 }
  0x11   : > { %419 = vmatprep.subr.bf16.mxu0 %v483_v1  ;;  %v458_v6 = vld [vmem:[%s169_s23] sm:$0xff]  }
  0x14   : > { %420 = vmatpush3.bf16.msra.mxu0 %v456_v4 }
  0x15   : > { %421 = vmatprep.subr.bf16.mxu0 %v483_v1 }
  0x18   : > { %422 = vmatpush3.bf16.msra.mxu0 %v457_v5 }
  0x1b   : > { %424 = vmatmul.mubr.msk.bf16.vlgmr.msra.gmra.mrb[0].mxu0 %vm232_vm1, %v458_v6 }
  0xee   : > { %v270_v7 = vpop.f32.mrb[0].mxu0 }
  0xef   : > { %v425_v8 = vpop.f32.mrb[1].mxu0  ;;  %v277_v10 = vmax.f32 %v270_v7, 0.0 }
  0xf0   : > { %v273_v9 = vpop.f32.mrb[2].mxu0 }
  0xf1   : > { %v278_v11 = vmax.f32 %v273_v9, 0.0  ;;  %v426_v12 = vpop.f32.mrb[3].mxu0 }
  0xf3   : > { %v405_v13 = vpack.c.bf16 %v278_v11, %v277_v10 }
  0xf5   : > { %406 = vst [vmem:[%s182_s30] sm:$0xff] %v405_v13  }
  0xf6 PF: > { %s12_s11 = sadd.s32 1, %s481_s11   ;;  %s551_s9 = smov %s477_s10 }
  0xf7   : > { %p9_p5 = scmp.ge.s32.totalorder %s12_s11, 4   ;;  %s552_s10 = smov %s554_s12 }
  0xf9   :  { %11 = sbr.rel (!%p9_p5) target bundleno = 2 (0x2), region = 61 }

// kernel: _forward.5
= control target key start
LH: loop header
LB: loop body
LE: loop exit
PB: predicated region body
PF: predicated region fallthrough
CT: control target
= control target key end

     0   :  { %s333_s1 = inlined_call_operand.vmem [shape: bf16[256,128], index: 1, kind: input, shape index: {}]   ;;  %s334_s0 = inlined_call_operand.vmem [shape: bf16[16,256], index: 0, kind: input, shape index: {}]   ;;  %s335_s2 = inlined_call_operand.vmem [shape: f32[16,128], index: 2, kind: output, shape index: {}]  }
   0x1   :  { %v239_v0 = vld [vmem:[%s333_s1 + $0x40] sm:$0xff]   ;;  %v241_v2 = vld [vmem:[%s333_s1 + $0x48] sm:$0xff]   ;;  %v243_v4 = vld [vmem:[%s333_s1 + $0x50] sm:$0xff]  }
   0x2   :  { %v240_v1 = vld [vmem:[%s333_s1] sm:$0xff]   ;;  %217 = vmatprep.subr.bf16.mxu0 %v239_v0  ;;  %v242_v3 = vld [vmem:[%s333_s1 + $0x8] sm:$0xff]   ;;  %v244_v5 = vld [vmem:[%s333_s1 + $0x10] sm:$0xff]  }
   0x3   :  { %218 = vmatpush3.bf16.msra.mxu0 %v240_v1  ;;  %v245_v6 = vld [vmem:[%s333_s1 + $0x58] sm:$0xff]   ;;  %v247_v8 = vld [vmem:[%s333_s1 + $0x60] sm:$0xff]   ;;  %v249_v10 = vld [vmem:[%s333_s1 + $0x68] sm:$0xff]  }
   0x4   :  { %219 = vmatprep.subr.bf16.mxu0 %v241_v2  ;;  %v246_v7 = vld [vmem:[%s333_s1 + $0x18] sm:$0xff]   ;;  %v248_v9 = vld [vmem:[%s333_s1 + $0x20] sm:$0xff]   ;;  %v250_v12 = vld [vmem:[%s333_s1 + $0x28] sm:$0xff]  }
   0x5   :  { %v257_v11 = vld [vmem:[%s334_s0 + $0x4] ss:$8 sps:$4 sm:$0xff]   ;;  %v251_v13 = vld [vmem:[%s333_s1 + $0x70] sm:$0xff]   ;;  %v253_v15 = vld [vmem:[%s333_s1 + $0x78] sm:$0xff]  }
   0x6   :  { %184 = vmatprep.mubr.bf16.mxu0 %v257_v11  ;;  %v252_v14 = vld [vmem:[%s333_s1 + $0x30] sm:$0xff]   ;;  %v254_v16 = vld [vmem:[%s333_s1 + $0x38] sm:$0xff]   ;;  %v255_v17 = vld [vmem:[%s334_s0] ss:$8 sps:$4 sm:$0xff]  }
   0x7   :  { %220 = vmatpush3.bf16.msra.mxu0 %v242_v3 }
   0x8   :  { %221 = vmatprep.subr.bf16.mxu0 %v243_v4 }
   0xb   :  { %222 = vmatpush3.bf16.msra.mxu0 %v244_v5 }
   0xc   :  { %223 = vmatprep.subr.bf16.mxu0 %v245_v6 }
   0xf   :  { %224 = vmatpush3.bf16.msra.mxu0 %v246_v7 }
  0x10   :  { %225 = vmatprep.subr.bf16.mxu0 %v247_v8 }
  0x13   :  { %226 = vmatpush3.bf16.msra.mxu0 %v248_v9 }
  0x14   :  { %227 = vmatprep.subr.bf16.mxu0 %v249_v10 }
  0x17   :  { %228 = vmatpush3.bf16.msra.mxu0 %v250_v12 }
  0x18   :  { %229 = vmatprep.subr.bf16.mxu0 %v251_v13 }
  0x1b   :  { %230 = vmatpush3.bf16.msra.mxu0 %v252_v14 }
  0x1c   :  { %231 = vmatprep.subr.bf16.mxu0 %v253_v15 }
  0x1f   :  { %232 = vmatpush3.bf16.msra.mxu0 %v254_v16 }
  0x22   :  { %185 = vmatmul.mubr.bf16.vlgmr.msra.gmra.mrb[0].mxu0 %v255_v17 }
  0xf5   :  { %v233_v18 = vpop.f32.mrb[0].mxu0 }
  0xf6   :  { %v234_v19 = vpop.f32.mrb[1].mxu0 }
  0xf7   :  { %v235_v20 = vadd.f32 %v234_v19, %v233_v18  ;;  %v236_v21 = vpop.f32.mrb[2].mxu0 }
  0xf8   :  { %v237_v22 = vpop.f32.mrb[3].mxu0 }
  0xf9   :  { %193 = vst [vmem:[%s335_s2] sm:$0xff] %v235_v20  ;;  %v238_v23 = vadd.f32 %v237_v22, %v236_v21 }
  0xfb   :  { %194 = vst [vmem:[%s335_s2 + $0x8] sm:$0xff] %v238_v23 }

</bundles_post_ra>
